<compile_context>
chip_gen: v6e
topology: v6e:2x2x1
jax: 0.10.0
libtpu: 0.0.40
codegen_flags: <defaults>
</compile_context>

<pallas_src>
import functools

import jax
import jax.numpy as jnp
from jax.experimental import pallas as pl
from jax.experimental.pallas import tpu as pltpu


def _round_up(a, b):
    return (a + b - 1) // b * b


def mlp_kernel(x_ref, w0_ref, b0_ref, wh_ref, bh_ref, wo_ref, bo_ref, o_ref,
               *, n_hidden_layers):
    # layers[0]: x @ W0 + b0, ReLU.  Operands are bf16 (MXU-native), the
    # accumulation is f32; bias add / ReLU stay in f32.
    h = jnp.dot(x_ref[...], w0_ref[...], preferred_element_type=jnp.float32)
    h = jnp.maximum(h + b0_ref[...], 0.0)

    # layers[1 .. n_layers-2]: hidden linears + ReLU, statically unrolled.
    # TODO(synk): stream wh[l] per layer (pltpu.emit_pipeline / extra grid
    # axis) once L*H_pad^2*2B outgrows ~1/4 of VMEM (v7x: ~16 MiB).
    for l in range(n_hidden_layers):
        h = jnp.dot(h.astype(jnp.bfloat16), wh_ref[l],
                    preferred_element_type=jnp.float32)
        # 2-D (1, H) bias slice -> clean sublane broadcast, no 1-D relayout.
        h = jnp.maximum(h + bh_ref[l:l + 1, :], 0.0)

    # layers[-1]: logits.  Padded class columns carry a -1e30 f32 bias so they
    # vanish (exp underflows to 0) in the f32 softmax below.
    logits = jnp.dot(h.astype(jnp.bfloat16), wo_ref[...],
                     preferred_element_type=jnp.float32) + bo_ref[...]

    # softmax over dim=1 (class dimension), max-subtracted for stability.
    m = jnp.max(logits, axis=-1, keepdims=True)
    e = jnp.exp(logits - m)
    denom = jnp.sum(e, axis=-1, keepdims=True)
    o_ref[...] = (e * pl.reciprocal(denom, approx=True)).astype(o_ref.dtype)


def _resident_spec(block_shape, index_map):
    """BlockSpec for a grid-invariant operand: single-buffer it (it never
    changes across the batch grid), halving its VMEM residency.  Matters most
    on v7x (64 MiB physical VMEM)."""
    try:
        return pl.BlockSpec(block_shape, index_map,
                            pipeline_mode=pl.Buffered(1))
    except (TypeError, AttributeError):
        # Older jax without pipeline_mode / Buffered: default double-buffering.
        return pl.BlockSpec(block_shape, index_map)


def prepare_mlp_params(w0, b0, wh, bh, wo, bo):
    """Pad every matmul dim to a lane-dense multiple of 128 and cast weights
    to bf16 (MXU-native); biases stay f32.  Call ONCE per parameter set.

    w0: [input_dim, n_hidden]; b0: [1, n_hidden];
    wh: [L, n_hidden, n_hidden]; bh: [L, n_hidden];
    wo: [n_hidden, n_classes];  bo: [1, n_classes].
    """
    input_dim, n_hidden = w0.shape
    n_classes = wo.shape[1]

    d_pad = _round_up(input_dim, 128)
    h_pad = _round_up(n_hidden, 128)
    c_pad = _round_up(n_classes, 128)

    w0_p = jnp.pad(w0, ((0, d_pad - input_dim),
                        (0, h_pad - n_hidden))).astype(jnp.bfloat16)
    b0_p = jnp.pad(b0, ((0, 0), (0, h_pad - n_hidden))).astype(jnp.float32)
    wh_p = jnp.pad(wh, ((0, 0), (0, h_pad - n_hidden),
                        (0, h_pad - n_hidden))).astype(jnp.bfloat16)
    bh_p = jnp.pad(bh, ((0, 0), (0, h_pad - n_hidden))).astype(jnp.float32)
    wo_p = jnp.pad(wo, ((0, h_pad - n_hidden),
                        (0, c_pad - n_classes))).astype(jnp.bfloat16)
    # Padded class columns get a -1e30 f32 bias so softmax ignores them.
    bo_p = jnp.pad(bo, ((0, 0), (0, c_pad - n_classes)),
                   constant_values=-1e30).astype(jnp.float32)

    return {"w0": w0_p, "b0": b0_p, "wh": wh_p, "bh": bh_p,
            "wo": wo_p, "bo": bo_p,
            "input_dim": int(input_dim), "n_classes": int(n_classes)}


def mlp_forward(x, params, *, tm=512, out_dtype=None):
    """y = softmax(relu(...relu(x@W0+b0)...) @ Wo + bo, axis=1)."""
    N, input_dim = x.shape
    assert input_dim == params["input_dim"]
    w0_p, b0_p = params["w0"], params["b0"]
    wh_p, bh_p = params["wh"], params["bh"]
    wo_p, bo_p = params["wo"], params["bo"]
    n_classes = params["n_classes"]
    d_pad, h_pad = w0_p.shape
    c_pad = wo_p.shape[1]
    L = wh_p.shape[0]
    out_dtype = x.dtype if out_dtype is None else out_dtype
    out_bytes = jnp.dtype(out_dtype).itemsize

    # Row tile: big enough to amortize the ~0.35us per-grid-step overhead and
    # fill MXU sublanes, but small enough that the grid has >= 2 steps so both
    # of v7x's TensorCores get work on the "parallel" batch axis.
    rows_per_core = -(-N // 2)                              # ceil(N / 2)
    tm = min(tm, max(8, _round_up(rows_per_core, 8)))
    n_padded = _round_up(N, tm)

    # x: bf16 cast (halves HBM traffic) + batch/feature padding in one shot.
    # In production wrap this function in jax.jit so XLA fuses the pad+cast
    # instead of materializing an extra HBM copy of the activations.
    x_b = x.astype(jnp.bfloat16)
    if n_padded != N or d_pad != input_dim:
        x_b = jnp.pad(x_b, ((0, n_padded - N), (0, d_pad - input_dim)))

    kernel = functools.partial(mlp_kernel, n_hidden_layers=L)

    flops = 2 * n_padded * (d_pad * h_pad + L * h_pad * h_pad + h_pad * c_pad)
    bytes_accessed = (2 * (x_b.size + w0_p.size + wh_p.size + wo_p.size)
                      + 4 * (b0_p.size + bh_p.size + bo_p.size)
                      + n_padded * c_pad * out_bytes)
    cost = pl.CostEstimate(flops=int(flops),
                           transcendentals=int(n_padded * c_pad),
                           bytes_accessed=int(bytes_accessed))

    # VMEM budget: weights single-buffered, x/out double-buffered, plus the
    # in-kernel f32 activations; ~2x headroom, clamped to v7x's 64 MiB and to
    # a 16 MiB floor (v5e's scoped default trips around there).
    resident = (2 * (w0_p.size + wh_p.size + wo_p.size)
                + 4 * (b0_p.size + bh_p.size + bo_p.size))
    streamed = 2 * (tm * d_pad * 2) + 2 * (tm * c_pad * out_bytes)
    acts = 4 * tm * (3 * h_pad + 2 * c_pad)
    vmem_limit = int(min(64 << 20,
                         max(16 << 20, 2 * (resident + streamed + acts))))

    out = pl.pallas_call(
        kernel,
        out_shape=jax.ShapeDtypeStruct((n_padded, c_pad), out_dtype),
        grid_spec=pltpu.PrefetchScalarGridSpec(
            num_scalar_prefetch=0,
            grid=(n_padded // tm,),
            in_specs=[
                # x: the only truly streamed operand (double-buffered).
                # TODO(synk): pipeline_mode=pl.Buffered(3) here if profiling
                # shows exposed DMA (short compute when hidden dims are small).
                pl.BlockSpec((tm, d_pad), lambda i: (i, 0)),
                # Grid-invariant weights/biases: VMEM-resident, single-buffer.
                _resident_spec((d_pad, h_pad), lambda i: (0, 0)),
                _resident_spec((1, h_pad), lambda i: (0, 0)),
                _resident_spec((L, h_pad, h_pad), lambda i: (0, 0, 0)),
                _resident_spec((L, h_pad), lambda i: (0, 0)),
                _resident_spec((h_pad, c_pad), lambda i: (0, 0)),
                _resident_spec((1, c_pad), lambda i: (0, 0)),
            ],
            out_specs=pl.BlockSpec((tm, c_pad), lambda i: (i, 0)),
        ),
        compiler_params=pltpu.CompilerParams(
            dimension_semantics=("parallel",),
            vmem_limit_bytes=vmem_limit),
        cost_estimate=cost,
    )(x_b, w0_p, b0_p, wh_p, bh_p, wo_p, bo_p)

    # Strip batch / class padding.
    return out[:N, :n_classes]


def mlp_reference(x, w0, b0, wh, bh, wo, bo):
    h = jnp.maximum(x @ w0 + b0, 0.0)
    for l in range(wh.shape[0]):
        h = jnp.maximum(h @ wh[l] + bh[l], 0.0)
    logits = h @ wo + bo
    return jax.nn.softmax(logits, axis=1)


if __name__ == "__main__":
    # Small shapes consistent with the module.
    batch, input_dim, n_hidden, n_classes, n_layers = 16, 32, 32, 8, 3
    # dropout = 0 -> self.dropout is None; activation = ReLU.
    # TODO(synk): stochastic training-time dropout (p > 0) not implemented.
    n_hidden_layers = n_layers - 2  # hidden (n_hidden->n_hidden) linears used

    key = jax.random.PRNGKey(0)
    ks = jax.random.split(key, 8)
    x = jax.random.normal(ks[0], (batch, input_dim), dtype=jnp.float32)
    w0 = jax.random.normal(ks[1], (input_dim, n_hidden), jnp.float32) * 0.1
    b0 = jax.random.normal(ks[2], (1, n_hidden), jnp.float32) * 0.1
    wh = jax.random.normal(ks[3], (n_hidden_layers, n_hidden, n_hidden),
                           jnp.float32) * 0.1
    bh = jax.random.normal(ks[4], (n_hidden_layers, n_hidden), jnp.float32) * 0.1
    wo = jax.random.normal(ks[5], (n_hidden, n_classes), jnp.float32) * 0.1
    bo = jax.random.normal(ks[6], (1, n_classes), jnp.float32) * 0.1

    # Weight padding + bf16 cast hoisted out of the per-call path.
    params = prepare_mlp_params(w0, b0, wh, bh, wo, bo)

    # Even batch (tiles exactly, grid of 2 steps).
    out = jax.block_until_ready(mlp_forward(x, params))
    ref = mlp_reference(x, w0, b0, wh, bh, wo, bo)
    assert out.shape == (batch, n_classes)
    # Tolerance accounts for bf16 matmul operands (f32 accumulation) and the
    # approx EUP reciprocal in the softmax; outputs are probabilities in [0,1].
    assert jnp.allclose(out, ref, atol=1e-2, rtol=5e-2), "mismatch vs reference"

    # Ragged batch (exercises the batch-padding / tail-handling path).
    x2 = jax.random.normal(ks[7], (13, input_dim), dtype=jnp.float32)
    out2 = jax.block_until_ready(mlp_forward(x2, params))
    ref2 = mlp_reference(x2, w0, b0, wh, bh, wo, bo)
    assert out2.shape == (13, n_classes)
    assert jnp.allclose(out2, ref2, atol=1e-2, rtol=5e-2), "ragged-N mismatch"

    print("KERNEL_OK")
</pallas_src>

<mosaic_0001>
module attributes {stable_mosaic.version = 11 : i64} {
  func.func @mlp_kernel(%arg0: i32, %arg1: memref<8x128xbf16, #tpu.memory_space<vmem>>, %arg2: memref<128x128xbf16, #tpu.memory_space<vmem>>, %arg3: memref<1x128xf32, #tpu.memory_space<vmem>>, %arg4: memref<1x128x128xbf16, #tpu.memory_space<vmem>>, %arg5: memref<1x128xf32, #tpu.memory_space<vmem>>, %arg6: memref<128x128xbf16, #tpu.memory_space<vmem>>, %arg7: memref<1x128xf32, #tpu.memory_space<vmem>>, %arg8: memref<8x128xf32, #tpu.memory_space<vmem>>) attributes {dimension_semantics = [#tpu.dimension_semantics<parallel>], iteration_bounds = array<i64: 2>, scalar_prefetch = 0 : i64, scratch_operands = 0 : i64, tpu.core_type = #tpu.core_type<tc>, window_params = [{transform_indices = @transform_0, window_bounds = array<i64: 8, 128>}, {pipeline_mode = #tpu.pipeline_mode<synchronous>, transform_indices = @transform_1, window_bounds = array<i64: 128, 128>}, {pipeline_mode = #tpu.pipeline_mode<synchronous>, transform_indices = @transform_2, window_bounds = array<i64: 1, 128>}, {pipeline_mode = #tpu.pipeline_mode<synchronous>, transform_indices = @transform_3, window_bounds = array<i64: 1, 128, 128>}, {pipeline_mode = #tpu.pipeline_mode<synchronous>, transform_indices = @transform_4, window_bounds = array<i64: 1, 128>}, {pipeline_mode = #tpu.pipeline_mode<synchronous>, transform_indices = @transform_5, window_bounds = array<i64: 128, 128>}, {pipeline_mode = #tpu.pipeline_mode<synchronous>, transform_indices = @transform_6, window_bounds = array<i64: 1, 128>}, {transform_indices = @transform_7, window_bounds = array<i64: 8, 128>}]} {
    %c0 = arith.constant 0 : index
    %c0_0 = arith.constant 0 : index
    %0 = vector.load %arg1[%c0, %c0_0] : memref<8x128xbf16, #tpu.memory_space<vmem>>, vector<8x128xbf16>
    %c0_1 = arith.constant 0 : index
    %c0_2 = arith.constant 0 : index
    %1 = vector.load %arg2[%c0_1, %c0_2] : memref<128x128xbf16, #tpu.memory_space<vmem>>, vector<128x128xbf16>
    %cst = arith.constant dense<0.000000e+00> : vector<8x128xf32>
    %2 = tpu.matmul %0, %1, %cst {dimension_numbers = #tpu.dot_dimension_numbers<[1], [0], [0], [1], [0, 0, 1, 1], [], []>} : vector<8x128xbf16>, vector<128x128xbf16>, vector<8x128xf32> -> vector<8x128xf32>
    %c0_3 = arith.constant 0 : index
    %c0_4 = arith.constant 0 : index
    %3 = vector.load %arg3[%c0_3, %c0_4] : memref<1x128xf32, #tpu.memory_space<vmem>>, vector<1x128xf32>
    %4 = vector.broadcast %3 : vector<1x128xf32> to vector<8x128xf32>
    %5 = arith.addf %2, %4 : vector<8x128xf32>
    %cst_5 = arith.constant 0.000000e+00 : f32
    %6 = vector.broadcast %cst_5 : f32 to vector<8x128xf32>
    %7 = arith.maximumf %5, %6 : vector<8x128xf32>
    %8 = arith.truncf %7 : vector<8x128xf32> to vector<8x128xbf16>
    %c0_6 = arith.constant 0 : index
    %c0_7 = arith.constant 0 : index
    %c0_8 = arith.constant 0 : index
    %9 = vector.load %arg4[%c0_6, %c0_7, %c0_8] : memref<1x128x128xbf16, #tpu.memory_space<vmem>>, vector<1x128x128xbf16>
    %10 = vector.shape_cast %9 : vector<1x128x128xbf16> to vector<128x128xbf16>
    %cst_9 = arith.constant dense<0.000000e+00> : vector<8x128xf32>
    %11 = tpu.matmul %8, %10, %cst_9 {dimension_numbers = #tpu.dot_dimension_numbers<[1], [0], [0], [1], [0, 0, 1, 1], [], []>} : vector<8x128xbf16>, vector<128x128xbf16>, vector<8x128xf32> -> vector<8x128xf32>
    %c0_10 = arith.constant 0 : index
    %c0_11 = arith.constant 0 : index
    %12 = vector.load %arg5[%c0_10, %c0_11] : memref<1x128xf32, #tpu.memory_space<vmem>>, vector<1x128xf32>
    %13 = vector.broadcast %12 : vector<1x128xf32> to vector<8x128xf32>
    %14 = arith.addf %11, %13 : vector<8x128xf32>
    %cst_12 = arith.constant 0.000000e+00 : f32
    %15 = vector.broadcast %cst_12 : f32 to vector<8x128xf32>
    %16 = arith.maximumf %14, %15 : vector<8x128xf32>
    %17 = arith.truncf %16 : vector<8x128xf32> to vector<8x128xbf16>
    %c0_13 = arith.constant 0 : index
    %c0_14 = arith.constant 0 : index
    %18 = vector.load %arg6[%c0_13, %c0_14] : memref<128x128xbf16, #tpu.memory_space<vmem>>, vector<128x128xbf16>
    %cst_15 = arith.constant dense<0.000000e+00> : vector<8x128xf32>
    %19 = tpu.matmul %17, %18, %cst_15 {dimension_numbers = #tpu.dot_dimension_numbers<[1], [0], [0], [1], [0, 0, 1, 1], [], []>} : vector<8x128xbf16>, vector<128x128xbf16>, vector<8x128xf32> -> vector<8x128xf32>
    %c0_16 = arith.constant 0 : index
    %c0_17 = arith.constant 0 : index
    %20 = vector.load %arg7[%c0_16, %c0_17] : memref<1x128xf32, #tpu.memory_space<vmem>>, vector<1x128xf32>
    %21 = vector.broadcast %20 : vector<1x128xf32> to vector<8x128xf32>
    %22 = arith.addf %19, %21 : vector<8x128xf32>
    %cst_18 = arith.constant dense<0xFF800000> : vector<8xf32>
    %23 = vector.multi_reduction <maximumf>, %22, %cst_18 [1] : vector<8x128xf32> to vector<8xf32>
    %24 = vector.shape_cast %23 : vector<8xf32> to vector<8x1xf32>
    %25 = vector.broadcast %24 : vector<8x1xf32> to vector<8x128xf32>
    %26 = arith.subf %22, %25 : vector<8x128xf32>
    %27 = math.exp %26 : vector<8x128xf32>
    %cst_19 = arith.constant dense<0.000000e+00> : vector<8xf32>
    %28 = vector.multi_reduction <add>, %27, %cst_19 [1] : vector<8x128xf32> to vector<8xf32>
    %29 = vector.shape_cast %28 : vector<8xf32> to vector<8x1xf32>
    %30 = tpu.reciprocal %29 {approx = true} : vector<8x1xf32> -> vector<8x1xf32>
    %31 = vector.broadcast %30 : vector<8x1xf32> to vector<8x128xf32>
    %32 = arith.mulf %27, %31 : vector<8x128xf32>
    %c0_20 = arith.constant 0 : index
    %c0_21 = arith.constant 0 : index
    %33 = vector.load %arg8[%c0_20, %c0_21] : memref<8x128xf32, #tpu.memory_space<vmem>>, vector<8x128xf32>
    tpu.vector_store %arg8[%c0_20, %c0_21], %32 {strides = array<i32>} : memref<8x128xf32, #tpu.memory_space<vmem>>, vector<8x128xf32>,
    return
  }
  func.func @transform_0(%arg0: i32) -> (i32, i32) {
    %c0_i32 = arith.constant 0 : i32
    %c0_i32_0 = arith.constant 0 : i32
    return %arg0, %c0_i32 : i32, i32
  }
  func.func @transform_1(%arg0: i32) -> (i32, i32) {
    %c0_i32 = arith.constant 0 : i32
    %c0_i32_0 = arith.constant 0 : i32
    %c0_i32_1 = arith.constant 0 : i32
    return %c0_i32, %c0_i32_0 : i32, i32
  }
  func.func @transform_2(%arg0: i32) -> (i32, i32) {
    %c0_i32 = arith.constant 0 : i32
    %c0_i32_0 = arith.constant 0 : i32
    %c0_i32_1 = arith.constant 0 : i32
    return %c0_i32, %c0_i32_0 : i32, i32
  }
  func.func @transform_3(%arg0: i32) -> (i32, i32, i32) {
    %c0_i32 = arith.constant 0 : i32
    %c0_i32_0 = arith.constant 0 : i32
    %c0_i32_1 = arith.constant 0 : i32
    %c0_i32_2 = arith.constant 0 : i32
    return %c0_i32, %c0_i32_0, %c0_i32_1 : i32, i32, i32
  }
  func.func @transform_4(%arg0: i32) -> (i32, i32) {
    %c0_i32 = arith.constant 0 : i32
    %c0_i32_0 = arith.constant 0 : i32
    %c0_i32_1 = arith.constant 0 : i32
    return %c0_i32, %c0_i32_0 : i32, i32
  }
  func.func @transform_5(%arg0: i32) -> (i32, i32) {
    %c0_i32 = arith.constant 0 : i32
    %c0_i32_0 = arith.constant 0 : i32
    %c0_i32_1 = arith.constant 0 : i32
    return %c0_i32, %c0_i32_0 : i32, i32
  }
  func.func @transform_6(%arg0: i32) -> (i32, i32) {
    %c0_i32 = arith.constant 0 : i32
    %c0_i32_0 = arith.constant 0 : i32
    %c0_i32_1 = arith.constant 0 : i32
    return %c0_i32, %c0_i32_0 : i32, i32
  }
  func.func @transform_7(%arg0: i32) -> (i32, i32) {
    %c0_i32 = arith.constant 0 : i32
    %c0_i32_0 = arith.constant 0 : i32
    return %arg0, %c0_i32 : i32, i32
  }
}

</mosaic_0001>

<bundles_post_ra>
// kernel: tpu_custom_call.1
= control target key start
LH: loop header
LB: loop body
LE: loop exit
PB: predicated region body
PF: predicated region fallthrough
CT: control target
= control target key end

     0   :  { %s1490_s0 = inlined_call_operand.hbm [shape: bf16[16,128], index: 0, kind: input, shape index: {}]   ;;  %s1491_s1 = inlined_call_operand.hbm [shape: bf16[128,128], index: 1, kind: input, shape index: {}]   ;;  %s1492_s2 = inlined_call_operand.vmem [shape: f32[1,128], index: 2, kind: input, shape index: {}]   ;;  %s1493_s3 = inlined_call_operand.hbm [shape: bf16[1,128,128], index: 3, kind: input, shape index: {}]   ;;  %s1494_s4 = inlined_call_operand.vmem [shape: f32[1,128], index: 4, kind: input, shape index: {}]   ;;  %s1495_s5 = inlined_call_operand.hbm [shape: bf16[128,128], index: 5, kind: input, shape index: {}]   ;;  %s1496_s6 = inlined_call_operand.vmem [shape: f32[1,128], index: 6, kind: input, shape index: {}]   ;;  %s1497_s7 = inlined_call_operand.hbm [shape: f32[16,128], index: 7, kind: output, shape index: {}]  }
   0x1   :  { %1502 = sst [smem:[#allocation15_spill]] %s1491_s1 }
   0x2   :  { %1503 = sst [smem:[#allocation16_spill]] %s1493_s3 }
   0x3   :  { %12 = vsyncpa [#allocation3], 0 }
   0x4   :  { %14 = vsyncpa [#allocation3 + $0x1], 0 }
   0x5   :  { %15 = vsyncpa [#allocation6], 0 }
   0x6   :  { %16 = vsyncpa [#allocation9], 0 }
   0x7   :  { %17 = vsyncpa [#allocation4], 0 }
   0x8   :  { %19 = vsyncpa [#allocation4 + $0x1], 0  ;;  %s1270_s24 = smov 0   ;;  %s1272_s25 = smov 0  }
   0x9   :  { %s1274_s26 = smov 0   ;;  %s1276_s27 = smov 0  }
   0xa LB: > { %s1291_s28 = sadd.s32 4294967295, %s1219_s27   ;;  %s800_s29 = sadd.s32 4294967294, %s1219_s27   ;;  %s1219_s27 = sphi %s1276_s27, %s1525_s27   ;;  %s1215_s26 = sphi %s1274_s26, %s1524_s26   ;;  %s1211_s25 = sphi %s1272_s25, %s1523_s25   ;;  %s1207_s24 = sphi %s1270_s24, %s1522_s24  }
   0xb   : > { %p45_p0 = scmp.ne.s32.totalorder %s1211_s25, %s1207_s24  ;;  %p1498_p1 = scmp.eq.s32.totalorder %s1291_s28, 0 }
   0xc   : > { %p201_p3 = scmp.eq.s32.totalorder %s800_s29, 1  ;;  %p801_p5 = scmp.ge.s32.totalorder %s1219_s27, 1 }
   0xd   : > { %p1300_p4 = por %p1498_p1, %p45_p0  ;;  %p208_p7 = scmp.lt.s32.totalorder %s1219_s27, 3 }
   0xe   : > { %p1305_p6 = por %p201_p3, %p45_p0  ;;  %s1221_s10 = smov [#allocation5]  }
   0xf   : > { %s1504_s30 = scalar_select %p1300_p4, 1, 0 }
  0x10   : > { %s1505_s8 = scalar_select %p1305_p6, 1, 0 }
  0x11   : > { %p1310_p8 = pnand %p801_p5, %p208_p7  ;;  %s220_s11 = sshll.u32 %s1221_s10, 4  ;;  %s221_s11 = int_to_ptr.vmem [resolvable:$true] %s220_s11 }
  0x12   : > { %s1222_s13 = smov [#allocation7]   ;;  %s1223_s15 = smov [#allocation8]  }
  0x13   : > { %s1506_s9 = scalar_select %p1310_p8, 1, 0 }
  0x14   : > { %p948_p9 = pneg %p1310_p8  ;;  %s236_s14 = sshll.u32 %s1222_s13, 4  ;;  %s237_s14 = int_to_ptr.vmem [resolvable:$true] %s236_s14 }
  0x15   : > { %s252_s16 = sshll.u32 %s1223_s15, 4  ;;  %s1052_s17 = scalar_lea.vmem %s221_s11, 1024  ;;  %s253_s16 = int_to_ptr.vmem [resolvable:$true] %s252_s16 }
  0x16   : > { %p1319_p11 = pnand %p948_p9, %p1498_p1  ;;  %p1053_p13 = scmp.ne.s32.totalorder %s221_s11, %s1052_s17 }
  0x17   : > { %p1060_p5 = scmp.lt.s32.totalorder %s221_s11, %s221_s11  ;;  %p1061_p7 = scmp.lt.s32.totalorder %s1052_s17, %s1052_s17 }
  0x18   : > { %p1043_p12 = pneg %p1319_p11 }
  0x19   : > { %p1062_p9 = por %p1061_p7, %p1060_p5 }
  0x1a   : > { %p1055_p0 = pnand %p1053_p13, %p1043_p12 }
  0x1c   : > { %p1056_p3 = pneg %p1055_p0 }
  0x1e   : > { %p1063_p10 = pnand %p1062_p9, %p1056_p3 }
  0x20   : > { %1066 = shalt.err (!%p1063_p10)
}
  0x21   : > { %s1224_s18 = smov 64   ;;  %s1225_s19 = smov 4  }
  0x22   : > { %s1508_s1 = sld [smem:[#allocation15_spill]]  ;;  %s1078_s22 = scalar_lea.vmem %s237_s14, 1024 }
  0x23   : > { %p1079_p1 = scmp.ne.s32.totalorder %s237_s14, %s1078_s22  ;;  %p1086_p2 = scmp.lt.s32.totalorder %s237_s14, %s237_s14 }
  0x24   : > { %p1087_p6 = scmp.lt.s32.totalorder %s1078_s22, %s1078_s22 }
  0x25   : > { %p1081_p13 = pnand %p1079_p1, %p1043_p12 }
  0x26   : > { %p1088_p5 = por %p1087_p6, %p1086_p2 }
  0x27   : > { %p1082_p0 = pneg %p1081_p13 }
  0x28   : > { %951 = dma.hbm_to_vmem [thread:$0]  (!%p1319_p11), %s1508_s1, 1024, %s221_s11, [#allocation6], %s1224_s18, %s1224_s18, %s1225_s19  }
  0x29   : > { %p1089_p3 = pnand %p1088_p5, %p1082_p0 }
  0x2b   : > { %1092 = shalt.err (!%p1089_p3)
}
  0x2c   : > { %s1509_s3 = sld [smem:[#allocation16_spill]]  ;;  %s1104_s10 = scalar_lea.vmem %s253_s16, 1024 }
  0x2d   : > { %p1105_p10 = scmp.ne.s32.totalorder %s253_s16, %s1104_s10  ;;  %p1112_p9 = scmp.lt.s32.totalorder %s253_s16, %s253_s16 }
  0x2e   : > { %p1113_p13 = scmp.lt.s32.totalorder %s1104_s10, %s1104_s10 }
  0x2f   : > { %p1107_p7 = pnand %p1105_p10, %p1043_p12 }
  0x30   : > { %p1114_p4 = por %p1113_p13, %p1112_p9 }
  0x31   : > { %p1108_p1 = pneg %p1107_p7 }
  0x32   : > { %954 = dma.hbm_to_vmem [thread:$0]  (!%p1319_p11), %s1509_s3, 1024, %s237_s14, [#allocation6], %s1224_s18, %s1224_s18, %s1225_s19  }
  0x33   : > { %p1115_p2 = pnand %p1114_p4, %p1108_p1 }
  0x35   : > { %1118 = shalt.err (!%p1115_p2)
}
  0x36   : > { %957 = dma.hbm_to_vmem [thread:$0]  (!%p1319_p11), %s1495_s5, 1024, %s253_s16, [#allocation9], %s1224_s18, %s1224_s18, %s1225_s19  }
  0x37   : > { %s1350_s14 = sadd.s32 1, %s1219_s27   ;;  %s32_s12 = sadd.s32 1, %s1215_s26 }
  0x38   : > { %s29_s15 = ssub.s32 %s1219_s27, %s1350_s14  ;;  %p39_p6 = scmp.ne.s32.totalorder %s1215_s26, %s1211_s25 }
  0x39   : > { %p30_p4 = scmp.eq.s32.totalorder %s29_s15, 0  ;;  %p40_p12 = scmp.eq.s32.totalorder %s1219_s27, 0 }
  0x3a   : > { %p969_p0 = scmp.lt.s32.totalorder %s1219_s27, 2  ;;  %p1510_p3 = scmp.eq.s32.totalorder %s1291_s28, 1 }
  0x3b   : > { %s1360_s17 = scalar_select %p30_p4, %s1215_s26, %s32_s12  }
  0x3c   : > { %p41_p5 = por %p40_p12, %p39_p6  ;;  %p1364_p10 = por %p1510_p3, %p39_p6 }
  0x3d   : > { %s269_s21 = sand.u32 1, %s1215_s26   ;;  %s807_s22 = sshll.u32 %s1219_s27, 6 }
  0x3e   : > { %s1511_s20 = scalar_select %p1364_p10, 1, 0 }
  0x3f   : > { %s806_s16 = sshll.u32 %s269_s21, 2  ;;  %s1373_s23 = scalar_lea.hbm %s1490_s0, %s807_s22 }
  0x40   : > { %s273_s29 = scalar_lea.vmem [#allocation2], %s806_s16  ;;  %p1375_p11 = pnand %p969_p0, %p41_p5 }
  0x41   : > { %s280_s10 = sshll.u32 %s273_s29, 4  ;;  %s270_s13 = scalar_lea.sflag [#allocation3], %s269_s21  ;;  %s281_s10 = int_to_ptr.vmem [resolvable:$true] %s280_s10 }
  0x42   : > { %s1119_s15 = scalar_lea.hbm %s1373_s23, 64  ;;  %p1121_p1 = pneg %p1375_p11 }
  0x43   : > { %p1120_p7 = scmp.ne.s32.totalorder %s1373_s23, %s1119_s15  ;;  %s1124_s18 = scalar_lea.hbm %s1490_s0, 128 }
  0x44   : > { %p1125_p2 = scmp.lt.s32.totalorder %s1373_s23, %s1490_s0  ;;  %p1126_p4 = scmp.lt.s32.totalorder %s1124_s18, %s1119_s15 }
  0x45   : > { %p1122_p9 = pnand %p1121_p1, %p1120_p7 }
  0x46   : > { %p1127_p6 = por %p1126_p4, %p1125_p2 }
  0x47   : > { %p1123_p13 = pneg %p1122_p9 }
  0x49   : > { %p1128_p12 = pnand %p1127_p6, %p1123_p13 }
  0x4b   : > { %1131 = shalt.err (!%p1128_p12)
}
  0x4c   : > { %s1132_s29 = scalar_lea.vmem %s281_s10, 64  ;;  %s1226_s21 = smov [#allocation2]  }
  0x4d   : > { %p1133_p0 = scmp.ne.s32.totalorder %s281_s10, %s1132_s29  ;;  %s1137_s1 = sshll.u32 %s1226_s21, 4  ;;  %s1138_s1 = int_to_ptr.vmem [resolvable:$false] %s1137_s1 }
  0x4e   : > { %s1139_s3 = scalar_lea.vmem %s1138_s1, 128  ;;  %p1140_p7 = scmp.lt.s32.totalorder %s281_s10, %s1138_s1 }
  0x4f   : > { %p1135_p5 = pnand %p1133_p0, %p1121_p1  ;;  %p1141_p9 = scmp.lt.s32.totalorder %s1139_s3, %s1132_s29 }
  0x51   : > { %p1136_p3 = pneg %p1135_p5  ;;  %p1142_p10 = por %p1141_p9, %p1140_p7 }
  0x53   : > { %p1143_p8 = pnand %p1142_p10, %p1136_p3 }
  0x55   : > { %1146 = shalt.err (!%p1143_p8)
}
  0x56   : > { %961 = dma.hbm_to_vmem [thread:$0]  (!%p1375_p11), %s1373_s23, 64, %s281_s10, %s270_s13  }
  0x57   : > { %p1513_p13 = scmp.ne.s32.totalorder %s1506_s9, 0 }
  0x58   : > { %s1396_s15 = sand.u32 (!%p1513_p13), 1, %s1211_s25   ;;  %p1514_p1 = scmp.ne.s32.totalorder (!%p1513_p13), %s1504_s30, 0 }
  0x59   : > { %289 = sbr.rel (%p1513_p13) target bundleno = 1051 (0x41b), region = 48  ;;  %s809_s12 = sshll.u32 (!%p1513_p13), %s1396_s15, 2 }
  0x5a   : > { %s292_s22 = scalar_lea.sflag (!%p1513_p13), [#allocation3], %s1396_s15  ;;  %s1400_s1 = scalar_lea.vmem (!%p1513_p13), [#allocation2], %s809_s12 }
  0x5e   : > { %1190 = dma.done.wait (%p1514_p1), %s292_s22, 64  }
  0x5f   : > { %1192 = vsyncadd (%p1514_p1), %s292_s22, 4294967232  ;;  %p1515_p8 = scmp.eq.s32.totalorder %s1291_s28, 0 }
  0x61   : > { %1194 = dma.done.wait (%p1515_p8), [#allocation6], 2048   ;;  %p1516_p10 = pmov %p1515_p8 }
  0x62   : > { %p1517_p11 = pmov %p1515_p8 }
  0x63   : > { %1196 = vsyncadd (%p1516_p10), [#allocation6], 4294965248 }
  0x64   : > { %1198 = dma.done.wait (%p1517_p11), [#allocation9], 1024   ;;  %p1518_p2 = pmov %p1515_p8 }
  0x65   : > { %v1227_v0 = vmov 0.0   ;;  %vm1228_vm0 = vmmov 0   ;;  %v1013_v1 = vld [vmem:[#allocation5 + $0x38] sm:$0xff]   ;;  %v1014_v2 = vld [vmem:[#allocation5 + $0x30] sm:$0xff]   ;;  %v1015_v3 = vld [vmem:[#allocation5 + $0x28] sm:$0xff]   ;;  %s813_s13 = sshll.u32 %s1396_s15, 3 }
  0x66   : > { %1200 = vsyncadd (%p1518_p2), [#allocation9], 4294966272  ;;  %872 = vmatprep.subr.bf16.mxu0 %v1227_v0  ;;  %888 = vmatprep.mubr.msk.bf16.mxu0 %vm1228_vm0, %v1227_v0  ;;  %v1021_v4 = vld [vmem:[#allocation7 + $0x38] sm:$0xff]   ;;  %v1016_v5 = vld [vmem:[#allocation5 + $0x20] sm:$0xff]   ;;  %s842_s18 = sshll.u32 %s1291_s28, 7  ;;  %s337_s19 = scalar_lea.vmem [#allocation10], %s813_s13 }
  0x67   : > { %892 = vmatprep.subr.bf16.mxu1 %v1227_v0  ;;  %908 = vmatprep.mubr.msk.bf16.mxu1 %vm1228_vm0, %v1227_v0  ;;  %v1022_v6 = vld [vmem:[#allocation7 + $0x30] sm:$0xff]   ;;  %v1017_v7 = vld [vmem:[#allocation5 + $0x18] sm:$0xff]   ;;  %v1023_v8 = vld [vmem:[#allocation7 + $0x28] sm:$0xff]   ;;  %s701_s16 = sshll.u32 %s337_s19, 4  ;;  %s699_s12 = scalar_lea.hbm %s1497_s7, %s842_s18  ;;  %s702_s16 = int_to_ptr.vmem [resolvable:$true] %s701_s16 }
  0x68   : > { %873 = vmatpush3.bf16.msra.mxu0 %v1013_v1  ;;  %893 = vmatpush3.bf16.msra.mxu1 %v1021_v4  ;;  %v1018_v9 = vld [vmem:[#allocation5 + $0x10] sm:$0xff]   ;;  %v1024_v10 = vld [vmem:[#allocation7 + $0x20] sm:$0xff]   ;;  %v1019_v11 = vld [vmem:[#allocation5 + $0x8] sm:$0xff]   ;;  %s688_s22 = scalar_lea.sflag [#allocation4], %s1396_s15  ;;  %p1519_p6 = scmp.ne.s32.totalorder %s1511_s20, 0 }
  0x69   : > { %874 = vmatprep.subr.bf16.mxu0 %v1227_v0  ;;  %894 = vmatprep.subr.bf16.mxu1 %v1227_v0  ;;  %v1025_v12 = vld [vmem:[#allocation7 + $0x18] sm:$0xff]   ;;  %v1020_v13 = vld [vmem:[#allocation5] sm:$0xff]   ;;  %v1026_v14 = vld [vmem:[#allocation7 + $0x10] sm:$0xff]   ;;  %s1229_s3 = smov [#allocation10]  }
  0x6a   : > { %v339_v15 = vld [vmem:[%s1400_s1] sm:$0xf]  ;;  %v1027_v16 = vld [vmem:[#allocation7 + $0x8] sm:$0xff]   ;;  %v1028_v17 = vld [vmem:[#allocation7] sm:$0xff]   ;;  %s1147_s1 = scalar_lea.vmem %s702_s16, 128  ;;  %s1151_s30 = sshll.u32 %s1229_s3, 4  ;;  %s1152_s30 = int_to_ptr.vmem [resolvable:$false] %s1151_s30 }
  0x6b   : > { %v1029_v18 = vld [vmem:[#allocation8 + $0x38] sm:$0xff]   ;;  %v1030_v19 = vld [vmem:[#allocation8 + $0x30] sm:$0xff]   ;;  %v1031_v20 = vld [vmem:[#allocation8 + $0x28] sm:$0xff]   ;;  %p1148_p4 = scmp.ne.s32.totalorder %s702_s16, %s1147_s1  ;;  %s1153_s28 = scalar_lea.vmem %s1152_s30, 256 }
  0x6c   : > { %875 = vmatpush3.bf16.msra.mxu0 %v1014_v2  ;;  %895 = vmatpush3.bf16.msra.mxu1 %v1022_v6  ;;  %v1032_v21 = vld [vmem:[#allocation8 + $0x20] sm:$0xff]   ;;  %v1033_v22 = vld [vmem:[#allocation8 + $0x18] sm:$0xff]   ;;  %v1034_v23 = vld [vmem:[#allocation8 + $0x10] sm:$0xff]   ;;  %p1154_p5 = scmp.lt.s32.totalorder %s702_s16, %s1152_s30  ;;  %p1155_p3 = scmp.lt.s32.totalorder %s1153_s28, %s1147_s1 }
  0x6d   : > { %876 = vmatprep.subr.bf16.mxu0 %v1227_v0  ;;  %896 = vmatprep.subr.bf16.mxu1 %v1227_v0  ;;  %v814_v24 = vld [vmem:[%s1492_s2] ss:$0 sm:$0xff]  ;;  %v1035_v32 = vld [vmem:[#allocation8 + $0x8] sm:$0xff]   ;;  %v1036_v33 = vld [vmem:[#allocation8] sm:$0xff]   ;;  %p1149_p12 = pnand %p1148_p4, %p1519_p6 }
  0x6e   : > { %v823_v34 = vld [vmem:[%s1494_s4] ss:$0 sm:$0xff]  ;;  %p1156_p7 = por %p1155_p3, %p1154_p5 }
  0x6f   : > { %v832_v42 = vld [vmem:[%s1496_s6] ss:$0 sm:$0xff]  ;;  %p1150_p0 = pneg %p1149_p12 }
  0x70   : > { %877 = vmatpush3.bf16.msra.mxu0 %v1015_v3  ;;  %897 = vmatpush3.bf16.msra.mxu1 %v1023_v8 }
  0x71   : > { %878 = vmatprep.subr.bf16.mxu0 %v1227_v0  ;;  %898 = vmatprep.subr.bf16.mxu1 %v1227_v0  ;;  %p1157_p9 = pnand %p1156_p7, %p1150_p0 }
  0x74   : > { %879 = vmatpush3.bf16.msra.mxu0 %v1016_v5  ;;  %899 = vmatpush3.bf16.msra.mxu1 %v1024_v10 }
  0x75   : > { %880 = vmatprep.subr.bf16.mxu0 %v1227_v0  ;;  %900 = vmatprep.subr.bf16.mxu1 %v1227_v0 }
  0x78   : > { %881 = vmatpush3.bf16.msra.mxu0 %v1017_v7  ;;  %901 = vmatpush3.bf16.msra.mxu1 %v1025_v12 }
  0x79   : > { %882 = vmatprep.subr.bf16.mxu0 %v1227_v0  ;;  %902 = vmatprep.subr.bf16.mxu1 %v1227_v0 }
  0x7c   : > { %883 = vmatpush3.bf16.msra.mxu0 %v1018_v9  ;;  %903 = vmatpush3.bf16.msra.mxu1 %v1026_v14 }
  0x7d   : > { %884 = vmatprep.subr.bf16.mxu0 %v1227_v0  ;;  %904 = vmatprep.subr.bf16.mxu1 %v1227_v0 }
  0x80   : > { %885 = vmatpush3.bf16.msra.mxu0 %v1019_v11  ;;  %905 = vmatpush3.bf16.msra.mxu1 %v1027_v16 }
  0x81   : > { %886 = vmatprep.subr.bf16.mxu0 %v1227_v0  ;;  %906 = vmatprep.subr.bf16.mxu1 %v1227_v0 }
  0x84   : > { %887 = vmatpush3.bf16.msra.mxu0 %v1020_v13  ;;  %907 = vmatpush3.bf16.msra.mxu1 %v1028_v17 }
  0x85   : > { %912 = vmatprep.subr.bf16.mxu0 %v1227_v0 }
  0x87   : > { %889 = vmatmul.mubr.bf16.vlgmr.msra.gmra.mxu0 %v339_v15 }
  0x88   : > { %928 = vmatprep.mubr.msk.bf16.mxu0 %vm1228_vm0, %v1227_v0  ;;  %913 = vmatpush3.bf16.msra.mxu0 %v1029_v18 }
  0x89   : > { %914 = vmatprep.subr.bf16.mxu0 %v1227_v0 }
  0x8c   : > { %915 = vmatpush3.bf16.msra.mxu0 %v1030_v19 }
  0x8d   : > { %916 = vmatprep.subr.bf16.mxu0 %v1227_v0 }
  0x90   : > { %917 = vmatpush3.bf16.msra.mxu0 %v1031_v20 }
  0x91   : > { %918 = vmatprep.subr.bf16.mxu0 %v1227_v0 }
  0x94   : > { %919 = vmatpush3.bf16.msra.mxu0 %v1032_v21 }
  0x95   : > { %920 = vmatprep.subr.bf16.mxu0 %v1227_v0 }
  0x98   : > { %921 = vmatpush3.bf16.msra.mxu0 %v1033_v22 }
  0x99   : > { %922 = vmatprep.subr.bf16.mxu0 %v1227_v0 }
  0x9c   : > { %923 = vmatpush3.bf16.msra.mxu0 %v1034_v23 }
  0x9d   : > { %924 = vmatprep.subr.bf16.mxu0 %v1227_v0 }
  0xa0   : > { %925 = vmatpush3.bf16.msra.mxu0 %v1035_v32 }
  0xa1   : > { %926 = vmatprep.subr.bf16.mxu0 %v1227_v0 }
  0xa4   : > { %927 = vmatpush3.bf16.msra.mxu0 %v1036_v33 }
 0x147   : > { %v445_v25 = vpop.f32.mrf.mxu0 }
 0x148   : > { %v446_v26 = vadd.f32 %v814_v24, %v445_v25 }
 0x149   : > { %v890_v27 = vpop.f32.mrf.mxu0 }
 0x14a   : > { %v451_v28 = vmax.f32 %v446_v26, 0.0 }
 0x14b   : > { %v448_v29 = vpop.f32.mrf.mxu0 }
 0x14c   : > { %v452_v30 = vpack.c.bf16 %v451_v28, %v451_v28 }
 0x14d   : > { %v891_v31 = vpop.f32.mrf.mxu0 }
 0x14e   : > { %909 = vmatmul.mubr.bf16.vlgmr.msra.gmra.mxu1 %v452_v30 }
 0x20e   : > { %v558_v35 = vpop.f32.mrf.mxu1 }
 0x20f   : > { %v559_v36 = vadd.f32 %v823_v34, %v558_v35 }
 0x210   : > { %v910_v37 = vpop.f32.mrf.mxu1 }
 0x211   : > { %v564_v38 = vmax.f32 %v559_v36, 0.0 }
 0x212   : > { %v561_v39 = vpop.f32.mrf.mxu1 }
 0x213   : > { %v565_v40 = vpack.c.bf16 %v564_v38, %v564_v38 }
 0x214   : > { %v911_v41 = vpop.f32.mrf.mxu1 }
 0x215   : > { %929 = vmatmul.mubr.bf16.vlgmr.msra.gmra.mxu0 %v565_v40 }
 0x2d5   : > { %v671_v43 = vpop.f32.mrf.mxu0 }
 0x2d6   : > { %v672_v44 = vadd.f32 %v832_v42, %v671_v43 }
 0x2d7   : > { %v930_v45 = vpop.f32.mrf.mxu0 }
 0x2d8   : > { %677 = vmax.xlane.f32.xlu0 %v672_v44 }
 0x2d9   : > { %v674_v46 = vpop.f32.mrf.mxu0 }
 0x2db   : > { %v931_v47 = vpop.f32.mrf.mxu0 }
 0x361   : > { %v678_v48 = vpop.xlane.xlu0 %677 }
 0x362   : > { %v679_v49 = vsub.f32 %v672_v44, %v678_v48 }
 0x364   : > { %v680_v50 = vmul.f32 1.442695, %v679_v49 }
 0x366   : > { %1037 = vpow2.f32 %v680_v50 }
 0x373   : > { %v1038_v51 = vpop.eup %1037 }
 0x374   : > { %682 = vadd.xlane.f32.xlu0 %v1038_v51 }
 0x3fd   : > { %v683_v52 = vpop.xlane.xlu0 %682 }
 0x3fe   : > { %1039 = vrcp.f32 %v683_v52 }
 0x40b   : > { %v1040_v53 = vpop.eup %1039 }
 0x40c   : > { %v685_v54 = vmul.f32 %v1040_v53, %v1038_v51 }
 0x40e   : > { %686 = vst [vmem:[%s337_s19] sm:$0xff] %v685_v54 }
 0x40f   : > { %1160 = shalt.err (!%p1157_p9)
}
 0x410   : > { %s1161_s9 = scalar_lea.hbm %s699_s12, 128  ;;  %s1165_s10 = scalar_lea.hbm %s1497_s7, 256 }
 0x411   : > { %p1162_p13 = scmp.ne.s32.totalorder %s699_s12, %s1161_s9  ;;  %p1166_p10 = scmp.lt.s32.totalorder %s699_s12, %s1497_s7 }
 0x412   : > { %p1167_p11 = scmp.lt.s32.totalorder %s1165_s10, %s1161_s9 }
 0x413   : > { %p1163_p1 = pnand %p1162_p13, %p1519_p6 }
 0x414   : > { %p1168_p2 = por %p1167_p11, %p1166_p10 }
 0x415   : > { %p1164_p8 = pneg %p1163_p1 }
 0x417   : > { %p1169_p4 = pnand %p1168_p2, %p1164_p8 }
 0x419   : > { %1172 = shalt.err (!%p1169_p4)
}
 0x41a   : > { %946 = dma.vmem_to_hbm [thread:$0]  (%p1519_p6), %s702_s16, 128, %s699_s12, %s688_s22  }
 0x41b PF: > { %s713_s18 = sand.u32 1, %s1207_s24   ;;  %p1520_p12 = scmp.ne.s32.totalorder %s1505_s8, 0 }
 0x41c   : > { %p1521_p0 = scmp.ge.s32.totalorder %s1219_s27, 2  ;;  %s714_s19 = scalar_lea.sflag [#allocation4], %s713_s18 }
 0x41e   : > { %p963_p5 = pnand %p1521_p0, %p1520_p12 }
 0x420   : > { %p964_p3 = pneg %p963_p5 }
 0x422   : > { %1202 = dma.done.wait (%p964_p3), %s714_s19, 128  }
 0x423   : > { %1204 = vsyncadd (%p964_p3), %s714_s19, 4294967168  ;;  %p22_p7 = scmp.ge.s32.totalorder %s1350_s14, 4   ;;  %s1522_s24 = smov %s1211_s25 }
 0x424   : > { %s1523_s25 = smov %s1215_s26  ;;  %s1524_s26 = smov %s1360_s17 }
 0x425   : > { %s1525_s27 = smov %s1350_s14  ;;  %24 = sbr.rel (!%p22_p7) target bundleno = 10 (0xa), region = 105 }
 0x42a   :  { %719 = vsyncpa [#allocation3], 1 }
 0x42b   :  { %721 = vsyncpa [#allocation3 + $0x1], 1 }
 0x42c   :  { %722 = vsyncpa [#allocation6], 1 }
 0x42d   :  { %723 = vsyncpa [#allocation9], 1 }
 0x42e   :  { %724 = vsyncpa [#allocation4], 1 }
 0x42f   :  { %726 = vsyncpa [#allocation4 + $0x1], 1 }

</bundles_post_ra>
